<compile_context>
chip_gen: v6e
topology: v6e:2x2x1
jax: 0.10.0
libtpu: 0.0.40
codegen_flags: <defaults>
</compile_context>

<pallas_src>
import jax
import jax.numpy as jnp
from jax import lax
from jax.experimental import pallas as pl
from jax.experimental.pallas import tpu as pltpu

EPS = 1e-5


def residual_kernel(x_ref, wt_ref, b_ref, gamma_ref, beta_ref, out_ref):
    """Linear -> BatchNorm1d (training batch stats) -> ReLU -> concat([z, x])."""
    x = x_ref[...]                                              # (B, I) f32

    # Linear on the MXU. wt_ref is already (I, O): plain (B,I)x(I,O) dot, no
    # in-kernel weight transpose. Operands may be bf16; accumulation is f32.
    y = jnp.dot(
        x.astype(wt_ref.dtype), wt_ref[...],
        preferred_element_type=jnp.float32,
    ) + b_ref[...]                                              # (B, O) f32

    # BatchNorm1d, training mode (biased variance), two-pass for stability:
    # y is fully resident, so the second sweep costs only VALU time.
    inv_b = 1.0 / y.shape[0]
    mean = jnp.sum(y, axis=0, keepdims=True) * inv_b            # (1, O)
    centered = y - mean
    var = jnp.sum(centered * centered, axis=0, keepdims=True) * inv_b
    z = centered * lax.rsqrt(var + EPS)                         # rsqrt -> EUP
    z = gamma_ref[...] * z + beta_ref[...]
    z = jnp.maximum(z, 0.0)                                     # ReLU

    # Fused concat: single lane-dense store of the whole output slab. The x
    # slab uses the original f32 x (exact passthrough, matching torch.cat).
    out_ref[...] = jnp.concatenate([z, x], axis=-1).astype(out_ref.dtype)


def residual_forward(x, w, b, gamma, beta, *, use_bf16_matmul=True):
    """x: (B, I) f32; w: (O, I) torch-Linear layout; b/gamma/beta: (O,).

    Returns concat([relu(batchnorm(x @ w.T + b)), x], axis=1) of shape (B, O+I).
    """
    B, I = x.shape
    O = w.shape[0]

    # One cheap XLA transpose outside the kernel -> no in-kernel vxpose.
    wt = w.T                                                    # (I, O)
    if use_bf16_matmul:
        wt = wt.astype(jnp.bfloat16)
    b2 = b.reshape(1, O).astype(jnp.float32)
    g2 = gamma.reshape(1, O).astype(jnp.float32)
    be2 = beta.reshape(1, O).astype(jnp.float32)

    vmem = pl.BlockSpec(memory_space=pltpu.MemorySpace.VMEM)

    # VMEM footprint: inputs + output + f32 temporaries (y, centered) + headroom.
    w_bytes = I * O * (2 if use_bf16_matmul else 4)
    footprint = (4 * B * I + w_bytes + 12 * O      # inputs
                 + 4 * B * (O + I)                 # output
                 + 2 * 4 * B * O)                  # y / centered temporaries
    vmem_limit = int(min(max(4 * footprint, 32 << 20), 64 << 20))

    cost = pl.CostEstimate(
        flops=2 * B * I * O + 10 * B * O,
        transcendentals=O,
        bytes_accessed=4 * B * I + w_bytes + 12 * O + 4 * B * (O + I),
    )

    return pl.pallas_call(
        residual_kernel,
        out_shape=jax.ShapeDtypeStruct((B, O + I), jnp.float32),
        in_specs=[vmem] * 5,
        out_specs=vmem,
        cost_estimate=cost,
        compiler_params=pltpu.CompilerParams(vmem_limit_bytes=vmem_limit),
    )(x, wt, b2, g2, be2)


def residual_ref(x, w, b, gamma, beta):
    """Pure-JAX reference (training-mode BatchNorm1d), mirrors the torch module."""
    y = x @ w.T + b
    mean = jnp.mean(y, axis=0, keepdims=True)
    var = jnp.mean((y - mean) ** 2, axis=0, keepdims=True)
    z = jnp.maximum(gamma * (y - mean) / jnp.sqrt(var + EPS) + beta, 0.0)
    return jnp.concatenate([z, x], axis=1)


def _run_case(key, B, I, O):
    kx, kw, kb, kg, kbe = jax.random.split(key, 5)
    x = jax.random.normal(kx, (B, I), dtype=jnp.float32)
    w = jax.random.normal(kw, (O, I), dtype=jnp.float32) * 0.1   # Linear.weight (O, I)
    b = jax.random.normal(kb, (O,), dtype=jnp.float32) * 0.1     # Linear.bias   (O,)
    gamma = 1.0 + 0.1 * jax.random.normal(kg, (O,), dtype=jnp.float32)  # BN.weight
    beta = 0.1 * jax.random.normal(kbe, (O,), dtype=jnp.float32)        # BN.bias

    ref = residual_ref(x, w, b, gamma, beta)

    # f32 MXU path: tight tolerance.
    out = jax.block_until_ready(
        residual_forward(x, w, b, gamma, beta, use_bf16_matmul=False))
    assert out.shape == (B, O + I), out.shape
    assert jnp.allclose(out, ref, atol=1e-4, rtol=1e-4), \
        f"f32 mismatch at B={B} I={I} O={O}"

    # bf16 MXU path (f32 accumulation + f32 BN): looser tolerance.
    out_bf = jax.block_until_ready(
        residual_forward(x, w, b, gamma, beta, use_bf16_matmul=True))
    assert out_bf.shape == (B, O + I), out_bf.shape
    assert jnp.allclose(out_bf, ref, atol=5e-2, rtol=5e-2), \
        f"bf16 mismatch at B={B} I={I} O={O}"
    # x passthrough slab must be bit-exact regardless of matmul precision.
    assert jnp.array_equal(out_bf[:, O:], x), "x slab not exact"


if __name__ == "__main__":
    key = jax.random.PRNGKey(0)
    k1, k2 = jax.random.split(key)

    # Toy shape from the module (unaligned features -> in-register lane-shifted concat).
    _run_case(k1, B=8, I=32, O=32)
    # 128-aligned (CTGAN-like) shape -> both concat slabs lane-aligned, unmasked stores.
    _run_case(k2, B=16, I=128, O=128)

    print("KERNEL_OK")
</pallas_src>

<mosaic_0001>
module attributes {stable_mosaic.version = 11 : i64} {
  func.func @residual_kernel(%arg0: memref<8x32xf32, #tpu.memory_space<vmem>>, %arg1: memref<32x32xf32, #tpu.memory_space<vmem>>, %arg2: memref<1x32xf32, #tpu.memory_space<vmem>>, %arg3: memref<1x32xf32, #tpu.memory_space<vmem>>, %arg4: memref<1x32xf32, #tpu.memory_space<vmem>>, %arg5: memref<8x64xf32, #tpu.memory_space<vmem>>) attributes {dimension_semantics = [], scalar_prefetch = 0 : i64, scratch_operands = 0 : i64, tpu.core_type = #tpu.core_type<tc>} {
    %c0 = arith.constant 0 : index
    %c0_0 = arith.constant 0 : index
    %0 = vector.load %arg0[%c0, %c0_0] : memref<8x32xf32, #tpu.memory_space<vmem>>, vector<8x32xf32>
    %c0_1 = arith.constant 0 : index
    %c0_2 = arith.constant 0 : index
    %1 = vector.load %arg1[%c0_1, %c0_2] : memref<32x32xf32, #tpu.memory_space<vmem>>, vector<32x32xf32>
    %cst = arith.constant dense<0.000000e+00> : vector<8x32xf32>
    %2 = tpu.matmul %0, %1, %cst {dimension_numbers = #tpu.dot_dimension_numbers<[1], [0], [0], [1], [0, 0, 1, 1], [], []>} : vector<8x32xf32>, vector<32x32xf32>, vector<8x32xf32> -> vector<8x32xf32>
    %c0_3 = arith.constant 0 : index
    %c0_4 = arith.constant 0 : index
    %3 = vector.load %arg2[%c0_3, %c0_4] : memref<1x32xf32, #tpu.memory_space<vmem>>, vector<1x32xf32>
    %4 = vector.broadcast %3 : vector<1x32xf32> to vector<8x32xf32>
    %5 = arith.addf %2, %4 : vector<8x32xf32>
    %cst_5 = arith.constant dense<0.000000e+00> : vector<32xf32>
    %6 = vector.multi_reduction <add>, %5, %cst_5 [0] : vector<8x32xf32> to vector<32xf32>
    %7 = vector.shape_cast %6 : vector<32xf32> to vector<1x32xf32>
    %cst_6 = arith.constant 1.250000e-01 : f32
    %8 = vector.broadcast %cst_6 : f32 to vector<1x32xf32>
    %9 = arith.mulf %7, %8 : vector<1x32xf32>
    %10 = vector.broadcast %9 : vector<1x32xf32> to vector<8x32xf32>
    %11 = arith.subf %5, %10 : vector<8x32xf32>
    %12 = arith.mulf %11, %11 : vector<8x32xf32>
    %cst_7 = arith.constant dense<0.000000e+00> : vector<32xf32>
    %13 = vector.multi_reduction <add>, %12, %cst_7 [0] : vector<8x32xf32> to vector<32xf32>
    %14 = vector.shape_cast %13 : vector<32xf32> to vector<1x32xf32>
    %cst_8 = arith.constant 1.250000e-01 : f32
    %15 = vector.broadcast %cst_8 : f32 to vector<1x32xf32>
    %16 = arith.mulf %14, %15 : vector<1x32xf32>
    %cst_9 = arith.constant 9.99999974E-6 : f32
    %17 = vector.broadcast %cst_9 : f32 to vector<1x32xf32>
    %18 = arith.addf %16, %17 : vector<1x32xf32>
    %19 = math.rsqrt %18 : vector<1x32xf32>
    %20 = vector.broadcast %19 : vector<1x32xf32> to vector<8x32xf32>
    %21 = arith.mulf %11, %20 : vector<8x32xf32>
    %c0_10 = arith.constant 0 : index
    %c0_11 = arith.constant 0 : index
    %22 = vector.load %arg3[%c0_10, %c0_11] : memref<1x32xf32, #tpu.memory_space<vmem>>, vector<1x32xf32>
    %23 = vector.broadcast %22 : vector<1x32xf32> to vector<8x32xf32>
    %24 = arith.mulf %23, %21 : vector<8x32xf32>
    %c0_12 = arith.constant 0 : index
    %c0_13 = arith.constant 0 : index
    %25 = vector.load %arg4[%c0_12, %c0_13] : memref<1x32xf32, #tpu.memory_space<vmem>>, vector<1x32xf32>
    %26 = vector.broadcast %25 : vector<1x32xf32> to vector<8x32xf32>
    %27 = arith.addf %24, %26 : vector<8x32xf32>
    %cst_14 = arith.constant 0.000000e+00 : f32
    %28 = vector.broadcast %cst_14 : f32 to vector<8x32xf32>
    %29 = arith.maximumf %27, %28 : vector<8x32xf32>
    %30 = tpu.concatenate %29, %0 in 1 : vector<8x32xf32>, vector<8x32xf32> -> vector<8x64xf32>
    %c0_15 = arith.constant 0 : index
    %c0_16 = arith.constant 0 : index
    %31 = vector.load %arg5[%c0_15, %c0_16] : memref<8x64xf32, #tpu.memory_space<vmem>>, vector<8x64xf32>
    tpu.vector_store %arg5[%c0_15, %c0_16], %30 {strides = array<i32>} : memref<8x64xf32, #tpu.memory_space<vmem>>, vector<8x64xf32>,
    return
  }
}

</mosaic_0001>

<bundles_post_ra>
// kernel: tpu_custom_call.1
= control target key start
LH: loop header
LB: loop body
LE: loop exit
PB: predicated region body
PF: predicated region fallthrough
CT: control target
= control target key end

     0   :  { %10 = vsyncpa [#allocation3], 0  ;;  %s349_s0 = inlined_call_operand.hbm [shape: f32[8,32], index: 0, kind: input, shape index: {}]   ;;  %s350_s1 = inlined_call_operand.hbm [shape: f32[32,32], index: 1, kind: input, shape index: {}]   ;;  %s351_s2 = inlined_call_operand.vmem [shape: f32[1,32], index: 2, kind: input, shape index: {}]   ;;  %s352_s3 = inlined_call_operand.vmem [shape: f32[1,32], index: 3, kind: input, shape index: {}]   ;;  %s353_s4 = inlined_call_operand.vmem [shape: f32[1,32], index: 4, kind: input, shape index: {}]   ;;  %s354_s5 = inlined_call_operand.hbm [shape: f32[8,64], index: 5, kind: output, shape index: {}]  }
   0x1   :  { %11 = vsyncpa [#allocation6], 0 }
   0x2   :  { %12 = vsyncpa [#allocation4], 0  ;;  %s289_s18 = smov [#allocation2]   ;;  %s290_s20 = smov [#allocation5]  }
   0x3   :  { %s19_s19 = sshll.u32 %s289_s18, 4  ;;  %s28_s21 = sshll.u32 %s290_s20, 4  ;;  %s20_s19 = int_to_ptr.vmem [resolvable:$true] %s19_s19  ;;  %s29_s21 = int_to_ptr.vmem [resolvable:$true] %s28_s21 }
   0x4   :  { %s231_s22 = scalar_lea.vmem %s20_s19, 128  ;;  %p236_p1 = scmp.lt.s32.totalorder %s20_s19, %s20_s19 }
   0x5   :  { %p232_p0 = scmp.ne.s32.totalorder %s20_s19, %s231_s22  ;;  %p237_p2 = scmp.lt.s32.totalorder %s231_s22, %s231_s22 }
   0x7   :  { %p238_p3 = por %p237_p2, %p236_p1 }
   0x9   :  { %p239_p4 = pnand %p238_p3, %p232_p0 }
   0xb   :  { %242 = shalt.err (!%p239_p4)
}
   0xc   :  { %22 = dma.hbm_to_vmem [thread:$0]  %s349_s0, 128, %s20_s19, [#allocation3]  }
   0xd   :  { %s251_s25 = scalar_lea.vmem %s29_s21, 512  ;;  %p256_p6 = scmp.lt.s32.totalorder %s29_s21, %s29_s21 }
   0xe   :  { %p252_p5 = scmp.ne.s32.totalorder %s29_s21, %s251_s25  ;;  %p257_p7 = scmp.lt.s32.totalorder %s251_s25, %s251_s25 }
  0x10   :  { %p258_p8 = por %p257_p7, %p256_p6 }
  0x12   :  { %p259_p9 = pnand %p258_p8, %p252_p5 }
  0x14   :  { %262 = shalt.err (!%p259_p9)
}
  0x15   :  { %s291_s26 = smov 128   ;;  %s292_s27 = smov 8  }
  0x16   :  { %34 = dma.hbm_to_vmem [thread:$0]  %s350_s1, 512, %s29_s21, [#allocation6], %s291_s26, %s291_s26, %s292_s27  }
  0x17   :  { %283 = dma.done.wait [#allocation3], 128  }
  0x18   :  { %284 = vsyncadd [#allocation3], 4294967168 }
  0x19   :  { %285 = dma.done.wait [#allocation6], 512  }
  0x1a   :  { %286 = vsyncadd [#allocation6], 4294966784  ;;  %v293_v0 = vmov 0.0   ;;  %vm294_vm0 = vmmov 0   ;;  %v51_v1 = vld [vmem:[#allocation5 + $0x18] sm:$0xff]  ;;  %v50_v2 = vld [vmem:[#allocation5 + $0x10] sm:$0xff] }
  0x1b   :  { %202 = vmatprep.subr.mxu0 %v293_v0  ;;  %210 = vmatprep.mubr.msk.f32.mxu0 %vm294_vm0, %v293_v0  ;;  %v47_v3 = vld [vmem:[#allocation2] sm:$0xff]  ;;  %v49_v4 = vld [vmem:[#allocation5 + $0x8] sm:$0xff]  ;;  %s295_s0 = smov 32   ;;  %v48_v5 = vld [vmem:[#allocation5] sm:$0xff]  ;;  %vm59_vm1 = vcmask 261120   ;;  %s296_s9 = smov [#allocation7]  }
  0x1c   :  { %203 = vmatpush3.msra.mxu0 %v51_v1  ;;  %171 = vrot.lane.b32.xlu0 %v47_v3, %s295_s0  ;;  %v193_v6 = vld [vmem:[%s351_s2] ss:$0 sm:$0xff]  ;;  %s183_s10 = sshll.u32 %s296_s9, 4  ;;  %vm175_vm2 = vcmask 523264   ;;  %s184_s10 = int_to_ptr.vmem [resolvable:$true] %s183_s10 }
  0x1d   :  { %204 = vmatprep.subr.mxu0 %v293_v0  ;;  %v195_v30 = vld [vmem:[%s352_s3] ss:$0 sm:$0xff]  ;;  %s263_s11 = scalar_lea.vmem %s184_s10, 128  ;;  %p268_p11 = scmp.lt.s32.totalorder %s184_s10, %s184_s10 }
  0x1e   :  { %205 = vmatpush3.msra.mxu0 %v50_v2  ;;  %v196_v32 = vld [vmem:[%s353_s4] ss:$0 sm:$0xff]  ;;  %p264_p10 = scmp.ne.s32.totalorder %s184_s10, %s263_s11  ;;  %p269_p12 = scmp.lt.s32.totalorder %s263_s11, %s263_s11 }
  0x1f   :  { %206 = vmatprep.subr.mxu0 %v293_v0 }
  0x20   :  { %207 = vmatpush3.msra.mxu0 %v49_v4  ;;  %p270_p13 = por %p269_p12, %p268_p11 }
  0x21   :  { %208 = vmatprep.subr.mxu0 %v293_v0 }
  0x22   :  { %209 = vmatpush3.msra.mxu0 %v48_v5  ;;  %p271_p0 = pnand %p270_p13, %p264_p10 }
  0x23   :  { %211 = vmatmul.mubr.msk.f32.vlgmr.msra.gmra.mxu0 %vm59_vm1, %v47_v3 }
  0x8e   :  { %v172_v35 = vpop.permute.xlu0 %171 }
  0xe3   :  { %v129_v7 = vpop.f32.mrf.mxu0 }
  0xe4   :  { %v130_v8 = vadd.f32 %v193_v6, %v129_v7 }
  0xe5   :  { %v212_v9 = vpop.f32.mrf.mxu0 }
  0xe6   :  { %v133_v10 = vsel %vm59_vm1, %v130_v8, 0.0 }
  0xe7   :  { %v134_v11 = vrot.slane %v133_v10, 4 }
  0xe9   :  { %v135_v12 = vadd.f32 %v134_v11, %v133_v10 }
  0xeb   :  { %v136_v13 = vrot.slane %v135_v12, 2 }
  0xed   :  { %v137_v14 = vadd.f32 %v136_v13, %v135_v12 }
  0xef   :  { %v138_v15 = vrot.slane %v137_v14, 1 }
  0xf1   :  { %v139_v16 = vadd.f32 %v138_v15, %v137_v14 }
  0xf3   :  { %v140_v17 = vmul.f32 0.125, %v139_v16 }
  0xf5   :  { %v141_v18 = vsub.f32 %v130_v8, %v140_v17 }
  0xf7   :  { %v142_v19 = vmul.f32 %v141_v18, %v141_v18 }
  0xf9   :  { %v143_v20 = vsel %vm59_vm1, %v142_v19, 0.0 }
  0xfa   :  { %v144_v21 = vrot.slane %v143_v20, 4 }
  0xfc   :  { %v145_v22 = vadd.f32 %v144_v21, %v143_v20 }
  0xfe   :  { %v146_v23 = vrot.slane %v145_v22, 2 }
 0x100   :  { %v147_v24 = vadd.f32 %v146_v23, %v145_v22 }
 0x102   :  { %v148_v25 = vrot.slane %v147_v24, 1 }
 0x104   :  { %v149_v26 = vadd.f32 %v148_v25, %v147_v24 }
 0x106   :  { %v150_v27 = vmul.f32 0.125, %v149_v26 }
 0x108   :  { %v151_v28 = vadd.f32 1e-05, %v150_v27 }
 0x10a   :  { %221 = vrsqrt.f32 %v151_v28 }
 0x117   :  { %v222_v29 = vpop.eup %221 }
 0x118   :  { %v153_v31 = vmul.f32 %v222_v29, %v141_v18 }
 0x11a   :  { %v161_v33 = vmul.f32 %v195_v30, %v153_v31 }
 0x11c   :  { %v169_v34 = vadd.f32 %v196_v32, %v161_v33 }
 0x11e   :  { %v170_v36 = vmax.f32 %v169_v34, 0.0 }
 0x120   :  { %v174_v37 = vsel %vm59_vm1, %v170_v36, %v172_v35 }
 0x121   :  { %176 = vst.msk [vmem:[#allocation7] sm:$0xff] %vm175_vm2, %v174_v37 }
 0x122   :  { %274 = shalt.err (!%p271_p0)
}
 0x123   :  { %186 = dma.vmem_to_hbm [thread:$0]  %s184_s10, 128, %s354_s5, [#allocation4]  }
 0x124   :  { %287 = dma.done.wait [#allocation4], 128  }
 0x125   :  { %288 = vsyncadd [#allocation4], 4294967168 }
 0x126   :  { %190 = vsyncpa [#allocation3], 1 }
 0x127   :  { %191 = vsyncpa [#allocation6], 1 }
 0x128   :  { %192 = vsyncpa [#allocation4], 1 }

</bundles_post_ra>
